<compile_context>
chip_gen: v7x
topology: tpu7x:2x2x1
jax: 0.10.0
libtpu: 0.0.40
codegen_flags: <defaults>
</compile_context>

<pallas_src>
import functools

import jax
import jax.numpy as jnp
from jax import lax
from jax.experimental import pallas as pl
from jax.experimental.pallas import tpu as pltpu

BN_EPS = 1e-5

USE_TANH_GELU = False   # True: tanh-approx GELU on the EUP slot (~1e-3 deviation)
CAST_X_BF16 = False     # True: bf16 x + weights (halves x HBM traffic, native bf16 MXU)

# Conservative per-kernel VMEM budget: stays under v5e's 16 MiB scoped default
# without needing vmem_limit_bytes; also well under v7x's 64 MiB physical.
_VMEM_BUDGET_BYTES = 12 << 20
_MAX_TILE_B = 8192


def _gelu(x):
    if USE_TANH_GELU:
        return jax.nn.gelu(x, approximate=True)
    # PyTorch nn.GELU() default: exact erf-based GELU.
    return 0.5 * x * (1.0 + lax.erf(x * (1.0 / jnp.sqrt(2.0).astype(x.dtype))))


def virus_classifier_kernel(
    x_ref,
    w1_ref, b1_ref,
    w2_ref, b2_ref,    # BN1 folded in
    w3_ref, b3_ref,    # BN2 folded in
    w4t_ref, b4_ref,   # final layer pre-transposed: (2, 32)
    o_ref,
):
    x = x_ref[...]

    # Linear(F,64) + GELU            (Dropout: identity in eval)
    h = jnp.dot(x, w1_ref[...], preferred_element_type=jnp.float32) + b1_ref[...]
    h = _gelu(h)
    # [BN1 folded] Linear(64,32) + GELU
    h = jnp.dot(h.astype(w2_ref.dtype), w2_ref[...],
                preferred_element_type=jnp.float32) + b2_ref[...]
    h = _gelu(h)
    # [BN2 folded] Linear(32,32) + GELU
    h = jnp.dot(h.astype(w3_ref.dtype), w3_ref[...],
                preferred_element_type=jnp.float32) + b3_ref[...]
    h = _gelu(h)

    # Linear(32,2) on the VPU/XLU: 2 output lanes would waste a full MXU push.
    w4_row0 = w4t_ref[0:1, :].astype(jnp.float32)                # (1, 32)
    w4_row1 = w4t_ref[1:2, :].astype(jnp.float32)                # (1, 32)
    l0 = jnp.sum(h * w4_row0, axis=-1, keepdims=True)            # (tile_b, 1)
    l1 = jnp.sum(h * w4_row1, axis=-1, keepdims=True)            # (tile_b, 1)
    col = lax.broadcasted_iota(jnp.int32, (h.shape[0], 2), 1)
    out = jnp.where(col == 0, l0, l1) + b4_ref[...]
    o_ref[...] = out.astype(o_ref.dtype)


def _fold_batchnorms(params):
    """Fold eval-mode BN1/BN2 into the following Linear layers (f32, trace time)."""
    (w1, b1, g1, be1, rm1, rv1,
     w2, b2, g2, be2, rm2, rv2,
     w3, b3, w4, b4) = params

    scale1 = g1 * lax.rsqrt(rv1 + BN_EPS)          # (1, 64)
    shift1 = be1 - rm1 * scale1                    # (1, 64)
    w2f = scale1.reshape(-1, 1) * w2               # (64, 32)
    b2f = b2 + shift1 @ w2                         # (1, 32)

    scale2 = g2 * lax.rsqrt(rv2 + BN_EPS)          # (1, 32)
    shift2 = be2 - rm2 * scale2                    # (1, 32)
    w3f = scale2.reshape(-1, 1) * w3               # (32, 32)
    b3f = b3 + shift2 @ w3                         # (1, 32)

    w4t = w4.T                                     # (2, 32) lane-dense for the VPU path

    if CAST_X_BF16:
        w1, w2f, w3f, w4t = (a.astype(jnp.bfloat16) for a in (w1, w2f, w3f, w4t))

    return (w1, b1, w2f, b2f, w3f, b3f, w4t, b4)


def _round_up(n, m):
    return ((n + m - 1) // m) * m


def _pick_tile_b(B, F, x_itemsize, align):
    """Largest batch tile that fits the VMEM budget (and keeps >=2 grid steps)."""
    # Per-row VMEM footprint: double-buffered x tile + f32 intermediates
    # (64 + 32 + 32 lanes counted as simultaneously live) + double-buffered
    # 2-wide output.  Weights are tiny and ignored.
    per_row = 2 * F * x_itemsize + (64 + 32 + 32) * 4 + 2 * 2 * 4
    tile = max(align, min(_MAX_TILE_B, _VMEM_BUDGET_BYTES // per_row))
    # Keep >= 2 grid steps when B allows, so the "parallel" batch axis actually
    # shards across v7x's two TensorCores (no effect on single-TC v5e/v6e).
    if B >= 2 * align:
        tile = min(tile, _round_up(pl.cdiv(B, 2), align))
    # No point in a tile larger than the (aligned) batch itself.
    tile = min(tile, _round_up(B, align))
    return _round_up(tile, align)


@functools.partial(jax.jit, static_argnames=("tile_b",))
def virus_classifier_forward(x, params, *, tile_b=None):
    """MLP forward, batch-tiled over a 1-D grid with VMEM-resident weights."""
    B, F = x.shape
    folded = _fold_batchnorms(params)

    if CAST_X_BF16:
        x = x.astype(jnp.bfloat16)               # cast BEFORE the DMA, not inside
    align = 16 if x.dtype == jnp.bfloat16 else 8  # bf16 packs 2 rows per sublane

    if tile_b is None:
        tile_b = _pick_tile_b(B, F, x.dtype.itemsize, align)
    tile_b = max(align, _round_up(tile_b, align))

    # Ragged edge block handled by Pallas OOB masking — no jnp.pad copy of x.
    grid = (pl.cdiv(B, tile_b),)

    weight_specs = [
        pl.BlockSpec(p.shape, lambda i: (0, 0))   # constant index -> VMEM-resident
        for p in folded
    ]

    flops = 2 * B * (F * 64 + 64 * 32 + 32 * 32 + 32 * 2)
    transcendentals = B * (64 + 32 + 32)
    bytes_accessed = (x.size * x.dtype.itemsize + B * 2 * 4
                      + sum(p.size * p.dtype.itemsize for p in folded))

    out = pl.pallas_call(
        virus_classifier_kernel,
        out_shape=jax.ShapeDtypeStruct((B, 2), jnp.float32),
        grid_spec=pltpu.PrefetchScalarGridSpec(
            num_scalar_prefetch=0,
            grid=grid,
            in_specs=[pl.BlockSpec((tile_b, F), lambda i: (i, 0))] + weight_specs,
            out_specs=pl.BlockSpec((tile_b, 2), lambda i: (i, 0)),
        ),
        compiler_params=pltpu.CompilerParams(
            dimension_semantics=("parallel",),    # 2-TC sharding on v7x
        ),
        cost_estimate=pl.CostEstimate(
            flops=flops,
            transcendentals=transcendentals,
            bytes_accessed=bytes_accessed,
        ),
    )(x, *folded)

    return out


def init_params(key, input_shape):
    """Deterministic parameter init (PyTorch-Linear-style uniform bounds)."""
    def linear(k, fan_in, fan_out):
        k1, k2 = jax.random.split(k)
        bound = 1.0 / jnp.sqrt(fan_in)
        w = jax.random.uniform(k1, (fan_in, fan_out), jnp.float32, -bound, bound)
        b = jax.random.uniform(k2, (1, fan_out), jnp.float32, -bound, bound)
        return w, b

    def batchnorm(k, n):
        k1, k2 = jax.random.split(k)
        gamma = jnp.ones((1, n), jnp.float32)
        beta = jnp.zeros((1, n), jnp.float32)
        running_mean = 0.1 * jax.random.normal(k1, (1, n), jnp.float32)
        running_var = 1.0 + 0.1 * jnp.abs(jax.random.normal(k2, (1, n), jnp.float32))
        return gamma, beta, running_mean, running_var

    ks = jax.random.split(key, 6)
    w1, b1 = linear(ks[0], input_shape, 64)
    g1, be1, rm1, rv1 = batchnorm(ks[1], 64)
    w2, b2 = linear(ks[2], 64, 32)
    g2, be2, rm2, rv2 = batchnorm(ks[3], 32)
    w3, b3 = linear(ks[4], 32, 32)
    w4, b4 = linear(ks[5], 32, 2)
    return (w1, b1, g1, be1, rm1, rv1,
            w2, b2, g2, be2, rm2, rv2,
            w3, b3,
            w4, b4)


def reference_forward(x, params):
    """Pure-JAX reference (un-folded BN, exact GELU) for correctness check."""
    (w1, b1, g1, be1, rm1, rv1,
     w2, b2, g2, be2, rm2, rv2,
     w3, b3, w4, b4) = params

    def gelu(v):
        return jax.nn.gelu(v, approximate=False)

    h = gelu(x @ w1 + b1)
    h = (h - rm1) * jax.lax.rsqrt(rv1 + BN_EPS) * g1 + be1
    h = gelu(h @ w2 + b2)
    h = (h - rm2) * jax.lax.rsqrt(rv2 + BN_EPS) * g2 + be2
    h = gelu(h @ w3 + b3)
    return h @ w4 + b4


if __name__ == "__main__":
    key = jax.random.PRNGKey(0)
    k_x, k_p, k_x2 = jax.random.split(key, 3)

    F = 32  # input_shape = 32 features
    params = init_params(k_p, F)

    # Small-batch case (single grid step, auto tile).
    B = 8
    x = jax.random.normal(k_x, (B, F), jnp.float32)
    out = jax.block_until_ready(virus_classifier_forward(x, params))
    ref = reference_forward(x, params)
    assert out.shape == (B, 2)
    assert jnp.allclose(out, ref, rtol=1e-4, atol=1e-4), "mismatch vs JAX reference (B=8)"

    # Larger, non-divisible batch with an explicit tile: exercises the
    # multi-step grid and the masked ragged edge block (no wrapper padding).
    B2 = 200
    x2 = jax.random.normal(k_x2, (B2, F), jnp.float32)
    out2 = jax.block_until_ready(virus_classifier_forward(x2, params, tile_b=64))
    ref2 = reference_forward(x2, params)
    assert out2.shape == (B2, 2)
    assert jnp.allclose(out2, ref2, rtol=1e-4, atol=1e-4), "mismatch vs JAX reference (B=200)"

    # Auto-sized tile on the same ragged batch (tile capped at ~B/2 -> 2 grid steps).
    out3 = jax.block_until_ready(virus_classifier_forward(x2, params))
    assert jnp.allclose(out3, ref2, rtol=1e-4, atol=1e-4), "mismatch vs JAX reference (auto tile)"

    print("KERNEL_OK")
</pallas_src>

<mosaic_0001>
module attributes {stable_mosaic.version = 11 : i64} {
  func.func @virus_classifier_kernel(%arg0: i32, %arg1: memref<8x32xf32, #tpu.memory_space<vmem>>, %arg2: memref<32x64xf32, #tpu.memory_space<vmem>>, %arg3: memref<1x64xf32, #tpu.memory_space<vmem>>, %arg4: memref<64x32xf32, #tpu.memory_space<vmem>>, %arg5: memref<1x32xf32, #tpu.memory_space<vmem>>, %arg6: memref<32x32xf32, #tpu.memory_space<vmem>>, %arg7: memref<1x32xf32, #tpu.memory_space<vmem>>, %arg8: memref<2x32xf32, #tpu.memory_space<vmem>>, %arg9: memref<1x2xf32, #tpu.memory_space<vmem>>, %arg10: memref<8x2xf32, #tpu.memory_space<vmem>>) attributes {dimension_semantics = [#tpu.dimension_semantics<parallel>], iteration_bounds = array<i64: 1>, scalar_prefetch = 0 : i64, scratch_operands = 0 : i64, tpu.core_type = #tpu.core_type<tc>, window_params = [{transform_indices = @transform_0, window_bounds = array<i64: 8, 32>}, {pipeline_mode = #tpu.pipeline_mode<synchronous>, transform_indices = @transform_1, window_bounds = array<i64: 32, 64>}, {pipeline_mode = #tpu.pipeline_mode<synchronous>, transform_indices = @transform_2, window_bounds = array<i64: 1, 64>}, {pipeline_mode = #tpu.pipeline_mode<synchronous>, transform_indices = @transform_3, window_bounds = array<i64: 64, 32>}, {pipeline_mode = #tpu.pipeline_mode<synchronous>, transform_indices = @transform_4, window_bounds = array<i64: 1, 32>}, {pipeline_mode = #tpu.pipeline_mode<synchronous>, transform_indices = @transform_5, window_bounds = array<i64: 32, 32>}, {pipeline_mode = #tpu.pipeline_mode<synchronous>, transform_indices = @transform_6, window_bounds = array<i64: 1, 32>}, {pipeline_mode = #tpu.pipeline_mode<synchronous>, transform_indices = @transform_7, window_bounds = array<i64: 2, 32>}, {pipeline_mode = #tpu.pipeline_mode<synchronous>, transform_indices = @transform_8, window_bounds = array<i64: 1, 2>}, {transform_indices = @transform_9, window_bounds = array<i64: 8, 2>}]} {
    %c0 = arith.constant 0 : index
    %c0_0 = arith.constant 0 : index
    %0 = vector.load %arg1[%c0, %c0_0] : memref<8x32xf32, #tpu.memory_space<vmem>>, vector<8x32xf32>
    %c0_1 = arith.constant 0 : index
    %c0_2 = arith.constant 0 : index
    %1 = vector.load %arg2[%c0_1, %c0_2] : memref<32x64xf32, #tpu.memory_space<vmem>>, vector<32x64xf32>
    %cst = arith.constant dense<0.000000e+00> : vector<8x64xf32>
    %2 = tpu.matmul %0, %1, %cst {dimension_numbers = #tpu.dot_dimension_numbers<[1], [0], [0], [1], [0, 0, 1, 1], [], []>} : vector<8x32xf32>, vector<32x64xf32>, vector<8x64xf32> -> vector<8x64xf32>
    %c0_3 = arith.constant 0 : index
    %c0_4 = arith.constant 0 : index
    %3 = vector.load %arg3[%c0_3, %c0_4] : memref<1x64xf32, #tpu.memory_space<vmem>>, vector<1x64xf32>
    %4 = vector.broadcast %3 : vector<1x64xf32> to vector<8x64xf32>
    %5 = arith.addf %2, %4 : vector<8x64xf32>
    %cst_5 = arith.constant 5.000000e-01 : f32
    %6 = vector.broadcast %cst_5 : f32 to vector<8x64xf32>
    %7 = arith.mulf %6, %5 : vector<8x64xf32>
    %cst_6 = arith.constant 2.000000e+00 : f32
    %8 = math.sqrt %cst_6 : f32
    %cst_7 = arith.constant 1.000000e+00 : f32
    %9 = arith.divf %cst_7, %8 : f32
    %10 = vector.broadcast %9 : f32 to vector<8x64xf32>
    %11 = arith.mulf %5, %10 : vector<8x64xf32>
    %12 = math.erf %11 : vector<8x64xf32>
    %cst_8 = arith.constant 1.000000e+00 : f32
    %13 = vector.broadcast %cst_8 : f32 to vector<8x64xf32>
    %14 = arith.addf %13, %12 : vector<8x64xf32>
    %15 = arith.mulf %7, %14 : vector<8x64xf32>
    %c0_9 = arith.constant 0 : index
    %c0_10 = arith.constant 0 : index
    %16 = vector.load %arg4[%c0_9, %c0_10] : memref<64x32xf32, #tpu.memory_space<vmem>>, vector<64x32xf32>
    %cst_11 = arith.constant dense<0.000000e+00> : vector<8x32xf32>
    %17 = tpu.matmul %15, %16, %cst_11 {dimension_numbers = #tpu.dot_dimension_numbers<[1], [0], [0], [1], [0, 0, 1, 1], [], []>} : vector<8x64xf32>, vector<64x32xf32>, vector<8x32xf32> -> vector<8x32xf32>
    %c0_12 = arith.constant 0 : index
    %c0_13 = arith.constant 0 : index
    %18 = vector.load %arg5[%c0_12, %c0_13] : memref<1x32xf32, #tpu.memory_space<vmem>>, vector<1x32xf32>
    %19 = vector.broadcast %18 : vector<1x32xf32> to vector<8x32xf32>
    %20 = arith.addf %17, %19 : vector<8x32xf32>
    %cst_14 = arith.constant 5.000000e-01 : f32
    %21 = vector.broadcast %cst_14 : f32 to vector<8x32xf32>
    %22 = arith.mulf %21, %20 : vector<8x32xf32>
    %cst_15 = arith.constant 2.000000e+00 : f32
    %23 = math.sqrt %cst_15 : f32
    %cst_16 = arith.constant 1.000000e+00 : f32
    %24 = arith.divf %cst_16, %23 : f32
    %25 = vector.broadcast %24 : f32 to vector<8x32xf32>
    %26 = arith.mulf %20, %25 : vector<8x32xf32>
    %27 = math.erf %26 : vector<8x32xf32>
    %cst_17 = arith.constant 1.000000e+00 : f32
    %28 = vector.broadcast %cst_17 : f32 to vector<8x32xf32>
    %29 = arith.addf %28, %27 : vector<8x32xf32>
    %30 = arith.mulf %22, %29 : vector<8x32xf32>
    %c0_18 = arith.constant 0 : index
    %c0_19 = arith.constant 0 : index
    %31 = vector.load %arg6[%c0_18, %c0_19] : memref<32x32xf32, #tpu.memory_space<vmem>>, vector<32x32xf32>
    %cst_20 = arith.constant dense<0.000000e+00> : vector<8x32xf32>
    %32 = tpu.matmul %30, %31, %cst_20 {dimension_numbers = #tpu.dot_dimension_numbers<[1], [0], [0], [1], [0, 0, 1, 1], [], []>} : vector<8x32xf32>, vector<32x32xf32>, vector<8x32xf32> -> vector<8x32xf32>
    %c0_21 = arith.constant 0 : index
    %c0_22 = arith.constant 0 : index
    %33 = vector.load %arg7[%c0_21, %c0_22] : memref<1x32xf32, #tpu.memory_space<vmem>>, vector<1x32xf32>
    %34 = vector.broadcast %33 : vector<1x32xf32> to vector<8x32xf32>
    %35 = arith.addf %32, %34 : vector<8x32xf32>
    %cst_23 = arith.constant 5.000000e-01 : f32
    %36 = vector.broadcast %cst_23 : f32 to vector<8x32xf32>
    %37 = arith.mulf %36, %35 : vector<8x32xf32>
    %cst_24 = arith.constant 2.000000e+00 : f32
    %38 = math.sqrt %cst_24 : f32
    %cst_25 = arith.constant 1.000000e+00 : f32
    %39 = arith.divf %cst_25, %38 : f32
    %40 = vector.broadcast %39 : f32 to vector<8x32xf32>
    %41 = arith.mulf %35, %40 : vector<8x32xf32>
    %42 = math.erf %41 : vector<8x32xf32>
    %cst_26 = arith.constant 1.000000e+00 : f32
    %43 = vector.broadcast %cst_26 : f32 to vector<8x32xf32>
    %44 = arith.addf %43, %42 : vector<8x32xf32>
    %45 = arith.mulf %37, %44 : vector<8x32xf32>
    %c0_27 = arith.constant 0 : index
    %c0_28 = arith.constant 0 : index
    %46 = vector.load %arg8[%c0_27, %c0_28] : memref<2x32xf32, #tpu.memory_space<vmem>>, vector<1x32xf32>
    %c1 = arith.constant 1 : index
    %c0_29 = arith.constant 0 : index
    %47 = vector.load %arg8[%c1, %c0_29] : memref<2x32xf32, #tpu.memory_space<vmem>>, vector<1x32xf32>
    %48 = vector.broadcast %46 : vector<1x32xf32> to vector<8x32xf32>
    %49 = arith.mulf %45, %48 : vector<8x32xf32>
    %cst_30 = arith.constant dense<0.000000e+00> : vector<8xf32>
    %50 = vector.multi_reduction <add>, %49, %cst_30 [1] : vector<8x32xf32> to vector<8xf32>
    %51 = vector.shape_cast %50 : vector<8xf32> to vector<8x1xf32>
    %52 = vector.broadcast %47 : vector<1x32xf32> to vector<8x32xf32>
    %53 = arith.mulf %45, %52 : vector<8x32xf32>
    %cst_31 = arith.constant dense<0.000000e+00> : vector<8xf32>
    %54 = vector.multi_reduction <add>, %53, %cst_31 [1] : vector<8x32xf32> to vector<8xf32>
    %55 = vector.shape_cast %54 : vector<8xf32> to vector<8x1xf32>
    %56 = tpu.iota {dimensions = array<i32: 1>} : vector<8x2xi32>
    %c0_i32 = arith.constant 0 : i32
    %57 = vector.broadcast %c0_i32 : i32 to vector<8x2xi32>
    %58 = arith.cmpi eq, %56, %57 : vector<8x2xi32>
    %59 = vector.shape_cast %51 : vector<8x1xf32> to vector<8x1xf32>
    %60 = vector.broadcast %59 : vector<8x1xf32> to vector<8x2xf32>
    %61 = vector.shape_cast %55 : vector<8x1xf32> to vector<8x1xf32>
    %62 = vector.broadcast %61 : vector<8x1xf32> to vector<8x2xf32>
    %63 = arith.select %58, %60, %62 : vector<8x2xi1>, vector<8x2xf32>
    %c0_32 = arith.constant 0 : index
    %c0_33 = arith.constant 0 : index
    %64 = vector.load %arg9[%c0_32, %c0_33] : memref<1x2xf32, #tpu.memory_space<vmem>>, vector<1x2xf32>
    %65 = vector.broadcast %64 : vector<1x2xf32> to vector<8x2xf32>
    %66 = arith.addf %63, %65 : vector<8x2xf32>
    %c0_34 = arith.constant 0 : index
    %c0_35 = arith.constant 0 : index
    %67 = vector.load %arg10[%c0_34, %c0_35] : memref<8x2xf32, #tpu.memory_space<vmem>>, vector<8x2xf32>
    tpu.vector_store %arg10[%c0_34, %c0_35], %66 {strides = array<i32>} : memref<8x2xf32, #tpu.memory_space<vmem>>, vector<8x2xf32>,
    return
  }
  func.func @transform_0(%arg0: i32) -> (i32, i32) {
    %c0_i32 = arith.constant 0 : i32
    %c0_i32_0 = arith.constant 0 : i32
    return %arg0, %c0_i32 : i32, i32
  }
  func.func @transform_1(%arg0: i32) -> (i32, i32) {
    %c0_i32 = arith.constant 0 : i32
    %c0_i32_0 = arith.constant 0 : i32
    %c0_i32_1 = arith.constant 0 : i32
    return %c0_i32, %c0_i32_0 : i32, i32
  }
  func.func @transform_2(%arg0: i32) -> (i32, i32) {
    %c0_i32 = arith.constant 0 : i32
    %c0_i32_0 = arith.constant 0 : i32
    %c0_i32_1 = arith.constant 0 : i32
    return %c0_i32, %c0_i32_0 : i32, i32
  }
  func.func @transform_3(%arg0: i32) -> (i32, i32) {
    %c0_i32 = arith.constant 0 : i32
    %c0_i32_0 = arith.constant 0 : i32
    %c0_i32_1 = arith.constant 0 : i32
    return %c0_i32, %c0_i32_0 : i32, i32
  }
  func.func @transform_4(%arg0: i32) -> (i32, i32) {
    %c0_i32 = arith.constant 0 : i32
    %c0_i32_0 = arith.constant 0 : i32
    %c0_i32_1 = arith.constant 0 : i32
    return %c0_i32, %c0_i32_0 : i32, i32
  }
  func.func @transform_5(%arg0: i32) -> (i32, i32) {
    %c0_i32 = arith.constant 0 : i32
    %c0_i32_0 = arith.constant 0 : i32
    %c0_i32_1 = arith.constant 0 : i32
    return %c0_i32, %c0_i32_0 : i32, i32
  }
  func.func @transform_6(%arg0: i32) -> (i32, i32) {
    %c0_i32 = arith.constant 0 : i32
    %c0_i32_0 = arith.constant 0 : i32
    %c0_i32_1 = arith.constant 0 : i32
    return %c0_i32, %c0_i32_0 : i32, i32
  }
  func.func @transform_7(%arg0: i32) -> (i32, i32) {
    %c0_i32 = arith.constant 0 : i32
    %c0_i32_0 = arith.constant 0 : i32
    %c0_i32_1 = arith.constant 0 : i32
    return %c0_i32, %c0_i32_0 : i32, i32
  }
  func.func @transform_8(%arg0: i32) -> (i32, i32) {
    %c0_i32 = arith.constant 0 : i32
    %c0_i32_0 = arith.constant 0 : i32
    %c0_i32_1 = arith.constant 0 : i32
    return %c0_i32, %c0_i32_0 : i32, i32
  }
  func.func @transform_9(%arg0: i32) -> (i32, i32) {
    %c0_i32 = arith.constant 0 : i32
    %c0_i32_0 = arith.constant 0 : i32
    return %arg0, %c0_i32 : i32, i32
  }
}

</mosaic_0001>

<bundles_post_ra>
// kernel: virus_classifier_forward.1
= control target key start
LH: loop header
LB: loop body
LE: loop exit
PB: predicated region body
PF: predicated region fallthrough
CT: control target
= control target key end

     0   :  { %v444_v0 = vmov 0.0|0.0   ;;  %vm445_vm0 = vmmov 0   ;;  %v446_v4 = vmov 0.0   ;;  %vm44_vm1 = vcmask 261120   ;;  %s576_s1 = inlined_call_operand.vmem [shape: f32[32,64], index: 1, kind: input, shape index: {}]   ;;  %s577_s0 = inlined_call_operand.vmem [shape: f32[8,32], index: 0, kind: input, shape index: {}]   ;;  %s578_s3 = inlined_call_operand.vmem [shape: f32[64,32], index: 3, kind: input, shape index: {}]   ;;  %s579_s2 = inlined_call_operand.vmem [shape: f32[1,64], index: 2, kind: input, shape index: {}]   ;;  %s580_s5 = inlined_call_operand.vmem [shape: f32[32,32], index: 5, kind: input, shape index: {}]   ;;  %s581_s4 = inlined_call_operand.vmem [shape: f32[1,32], index: 4, kind: input, shape index: {}]   ;;  %s582_s6 = inlined_call_operand.vmem [shape: f32[1,32], index: 6, kind: input, shape index: {}]   ;;  %s583_s7 = inlined_call_operand.vmem [shape: f32[2,32], index: 7, kind: input, shape index: {}]   ;;  %s584_s8 = inlined_call_operand.vmem [shape: f32[1,2], index: 8, kind: input, shape index: {}]   ;;  %s585_s9 = inlined_call_operand.vmem [shape: f32[8,2], index: 9, kind: output, shape index: {}]  }
   0x1   :  { %411 = vmatprep.subr.bf16.mxu0 %v444_v0  ;;  %v33_v1 = vld [vmem:[%s576_s1] sm:$0xff]  ;;  %v34_v2 = vld [vmem:[%s576_s1 + $0x8] sm:$0xff]  ;;  %v35_v3 = vld [vmem:[%s576_s1 + $0x10] sm:$0xff]  ;;  %378 = vmatprep.mubr.msk.f32.mxu0 %vm445_vm0, %v446_v4  ;;  %vm138_vm2 = vcmask 523264   ;;  %v324_v60 = vlaneseq  ;;  %vm336_vm4 = vcmask 15360  }
   0x2   :  { %v412_v5 = vpack.c.bf16 %v34_v2, %v33_v1  ;;  %v36_v6 = vld [vmem:[%s576_s1 + $0x18] sm:$0xff]  ;;  %417 = vmatprep.subr.bf16.mxu1 %v444_v0  ;;  %397 = vmatprep.mubr.msk.f32.mxu1 %vm445_vm0, %v446_v4  ;;  %v32_v8 = vld [vmem:[%s577_s0] sm:$0xff]  ;;  %v124_v10 = vld [vmem:[%s578_s3 + $0x8] sm:$0xff] }
   0x3   :  { %v415_v7 = vpack.c.bf16 %v36_v6, %v35_v3  ;;  %v123_v9 = vld [vmem:[%s578_s3] sm:$0xff]  ;;  %v125_v12 = vld [vmem:[%s578_s3 + $0x10] sm:$0xff]  ;;  %v126_v13 = vld [vmem:[%s578_s3 + $0x18] sm:$0xff]  ;;  %v325_v61 = vand.u32 127, %v324_v60 }
   0x4   :  { %413 = vmatpush3.bf16.msra.mxu0 %v412_v5  ;;  %v418_v11 = vpack.c.bf16 %v124_v10, %v123_v9  ;;  %v421_v14 = vpack.c.bf16 %v126_v13, %v125_v12  ;;  %v127_v15 = vld [vmem:[%s578_s3 + $0x20] sm:$0xff]  ;;  %v128_v16 = vld [vmem:[%s578_s3 + $0x28] sm:$0xff]  ;;  %v129_v18 = vld [vmem:[%s578_s3 + $0x30] sm:$0xff] }
   0x5   :  { %414 = vmatprep.subr.bf16.mxu0 %v444_v0  ;;  %v424_v17 = vpack.c.bf16 %v128_v16, %v127_v15  ;;  %v130_v19 = vld [vmem:[%s578_s3 + $0x38] sm:$0xff]  ;;  %v342_v21 = vld [vmem:[%s579_s2] ss:$0 sm:$0xff]  ;;  %v218_v31 = vld [vmem:[%s580_s5 + $0x8] sm:$0xff]  ;;  %vm326_vm3 = vcmp.eq.s32.totalorder %v325_v61, 0 }
   0x6   :  { %419 = vmatpush3.bf16.msra.mxu1 %v418_v11  ;;  %v427_v20 = vpack.c.bf16 %v130_v19, %v129_v18  ;;  %v217_v30 = vld [vmem:[%s580_s5] sm:$0xff]  ;;  %v219_v33 = vld [vmem:[%s580_s5 + $0x10] sm:$0xff]  ;;  %v220_v34 = vld [vmem:[%s580_s5 + $0x18] sm:$0xff] }
   0x7   :  { %420 = vmatprep.subr.bf16.mxu1 %v444_v0  ;;  %v430_v32 = vpack.c.bf16 %v218_v31, %v217_v30  ;;  %v433_v35 = vpack.c.bf16 %v220_v34, %v219_v33  ;;  %v344_v36 = vld [vmem:[%s581_s4] ss:$0 sm:$0xff]  ;;  %v349_v55 = vld [vmem:[%s583_s7 + $0x1] ss:$0 sm:$0xff] }
   0x8   :  { %416 = vmatpush3.bf16.msra.mxu0 %v415_v7  ;;  %v346_v45 = vld [vmem:[%s582_s6] ss:$0 sm:$0xff] }
   0x9   :  { %429 = vmatprep.subr.bf16.mxu0 %v444_v0  ;;  %v348_v53 = vld [vmem:[%s583_s7] ss:$0 sm:$0xff] }
   0xa   :  { %422 = vmatpush3.bf16.msra.mxu1 %v421_v14  ;;  %v350_v63 = vld [vmem:[%s584_s8] ss:$0 sm:$0xff] }
   0xb   :  { %379 = vmatmul.mubr.msk.f32.vlgmr.msra.gmra.mrb[0].mxu0 %vm44_vm1, %v32_v8  ;;  %423 = vmatprep.subr.bf16.mxu1 %v444_v0 }
   0xc   :  { %408 = vmatprep.mubr.msk.f32.mxu0 %vm445_vm0, %v446_v4  ;;  %431 = vmatpush3.bf16.msra.mxu0 %v430_v32 }
   0xd   :  { %432 = vmatprep.subr.bf16.mxu0 %v444_v0 }
   0xe   :  { %425 = vmatpush3.bf16.msra.mxu1 %v424_v17 }
   0xf   :  { %426 = vmatprep.subr.bf16.mxu1 %v444_v0 }
  0x10   :  { %434 = vmatpush3.bf16.msra.mxu0 %v433_v35 }
  0x12   :  { %428 = vmatpush3.bf16.msra.mxu1 %v427_v20 }
  0xde   :  { %v114_v22 = vpop.f32.mrb[0].mxu0 }
  0xdf   :  { %v115_v23 = vadd.f32 %v342_v21, %v114_v22  ;;  %v380_v24 = vpop.f32.mrb[1].mxu0 }
  0xe1   :  { %v119_v25 = vmul.f32 0.70710677, %v115_v23  ;;  %v118_v27 = vmul.f32 0.5, %v115_v23 }
  0xe3   :  { %438 = verf.f32 %v119_v25 }
  0xed   :  { %v439_v26 = vpop.eup %438 }
  0xee   :  { %v121_v28 = vadd.f32 1.0, %v439_v26 }
  0xf0   :  { %v122_v29 = vmul.f32 %v121_v28, %v118_v27 }
  0xf2   :  { %398 = vmatmul.mubr.msk.f32.vlgmr.msra.gmra.mrb[0].mxu1 %vm138_vm2, %v122_v29 }
 0x1c5   :  { %v208_v37 = vpop.f32.mrb[0].mxu1 }
 0x1c6   :  { %v209_v38 = vadd.f32 %v344_v36, %v208_v37  ;;  %v399_v39 = vpop.f32.mrb[1].mxu1 }
 0x1c8   :  { %v213_v40 = vmul.f32 0.70710677, %v209_v38  ;;  %v212_v42 = vmul.f32 0.5, %v209_v38 }
 0x1ca   :  { %440 = verf.f32 %v213_v40 }
 0x1d4   :  { %v441_v41 = vpop.eup %440 }
 0x1d5   :  { %v215_v43 = vadd.f32 1.0, %v441_v41 }
 0x1d7   :  { %v216_v44 = vmul.f32 %v215_v43, %v212_v42 }
 0x1d9   :  { %409 = vmatmul.mubr.msk.f32.vlgmr.msra.gmra.mrb[2].mxu0 %vm44_vm1, %v216_v44 }
 0x2ac   :  { %v297_v46 = vpop.f32.mrb[2].mxu0 }
 0x2ad   :  { %v298_v47 = vadd.f32 %v346_v45, %v297_v46  ;;  %v410_v48 = vpop.f32.mrb[3].mxu0 }
 0x2af   :  { %v302_v49 = vmul.f32 0.70710677, %v298_v47  ;;  %v301_v51 = vmul.f32 0.5, %v298_v47 }
 0x2b1   :  { %442 = verf.f32 %v302_v49 }
 0x2bb   :  { %v443_v50 = vpop.eup %442 }
 0x2bc   :  { %v304_v52 = vadd.f32 1.0, %v443_v50 }
 0x2be   :  { %v305_v54 = vmul.f32 %v304_v52, %v301_v51 }
 0x2c0   :  { %v312_v56 = vmul.f32 %v348_v53, %v305_v54  ;;  %v320_v58 = vmul.f32 %v349_v55, %v305_v54 }
 0x2c2   :  { %v313_v57 = vsel %vm44_vm1, %v312_v56, 0.0  ;;  %v321_v59 = vsel %vm44_vm1, %v320_v58, 0.0 }
 0x2c3   :  { %314 = vadd.xlane.f32.xlu0 %v313_v57 }
 0x2c7   :  { %322 = vadd.xlane.f32.xlu0 %v321_v59 }
 0x350   :  { %v315_v62 = vpop.xlane.xlu0 %314 }
 0x354   :  { %v323_v0 = vpop.xlane.xlu0 %322 }
 0x355   :  { %v327_v1 = vsel %vm326_vm3, %v315_v62, %v323_v0 }
 0x356   :  { %v335_v2 = vadd.f32 %v350_v63, %v327_v1 }
 0x358   :  { %337 = vst.msk [vmem:[%s585_s9] sm:$0xff] %vm336_vm4, %v335_v2 }

</bundles_post_ra>
